<compile_context>
chip_gen: v6e
topology: v6e:2x2x1
jax: 0.10.0
libtpu: 0.0.40
codegen_flags: <defaults>
</compile_context>

<pallas_src>
import jax
import jax.numpy as jnp
import numpy as np
from jax.experimental import pallas as pl
from jax.experimental.pallas import tpu as pltpu


def _round_up(x, m):
    return (x + m - 1) // m * m


def _vmem_limit(bytes_needed, cap=48 * 2**20, floor=32 * 2**20):
    """Explicit scoped-VMEM budget: 2x estimate, clamped to a v7x-safe cap."""
    return int(min(cap, max(floor, 2 * bytes_needed)))


# --------------------------------------------------------------------------
# Kernel 1: fused conv (x) fc  ->  lin = relu(slab @ w_fused + bias)
# --------------------------------------------------------------------------
def lin_kernel(slab_ref, w_ref, bias_ref, lin_ref):
    """slab (TQ, 2*K*D) f32, w (2*K*D, D) f32, bias (1, D) f32 -> lin (TQ, D) bf16."""
    pre = jnp.dot(slab_ref[...], w_ref[...],
                  preferred_element_type=jnp.float32)            # (TQ, D) f32
    pre = pre + bias_ref[...]
    lin_ref[...] = jnp.maximum(pre, 0.0).astype(lin_ref.dtype)


# --------------------------------------------------------------------------
# Kernel 2: scores = sigmoid(lin @ entity^T), tiled over (E outer, Q inner)
# --------------------------------------------------------------------------
def score_kernel(lin_ref, ent_ref, out_ref):
    """lin (TQ, D) bf16, ent (TE, D) bf16 -> out (TQ, TE) out_dtype."""
    # Contract last dims of both operands: no in-kernel transpose, bf16 MXU
    # inputs with f32 accumulation.
    scores = jax.lax.dot_general(
        lin_ref[...], ent_ref[...],
        dimension_numbers=(((1,), (1,)), ((), ())),
        preferred_element_type=jnp.float32)                      # (TQ, TE) f32
    # sigmoid(x) == 0.5 * tanh(0.5 * x) + 0.5  (exact; tanh goes to the EUP).
    out_ref[...] = (0.5 * jnp.tanh(0.5 * scores) + 0.5).astype(out_ref.dtype)


# --------------------------------------------------------------------------
# Wrapper: gather + im2col + weight fold, then the two pallas_calls.
# --------------------------------------------------------------------------
def conv_transe_forward(entity_ebd, relation_ebd, query, conv_w, conv_b, fc_w,
                        *, num_channel, kernel_length,
                        tq=512, te=2048,
                        score_dtype=jnp.bfloat16, out_dtype=jnp.bfloat16):
    E, D = entity_ebd.shape
    Q = query.shape[0]
    C, K = num_channel, kernel_length

    entity_f32 = entity_ebd.astype(jnp.float32)
    relation_f32 = relation_ebd.astype(jnp.float32)
    e_rows = entity_f32[query[:, 0]]                   # (Q, D)
    r_rows = relation_f32[query[:, 1]]                 # (Q, D)

    # nn.ZeroPad2d padding (width only), matches the module exactly.
    if K % 2 != 0:
        pad_l, pad_r = K // 2, K // 2
    else:
        pad_l, pad_r = K // 2 - 1, K // 2
    e_pad = jnp.pad(e_rows, ((0, 0), (pad_l, pad_r)))  # (Q, D+K-1)
    r_pad = jnp.pad(r_rows, ((0, 0), (pad_l, pad_r)))  # (Q, D+K-1)

    # im2col tap slab: column index = h*K*D + j*D + w  (h=0 entity, h=1 rel).
    taps = ([e_pad[:, j:j + D] for j in range(K)]
            + [r_pad[:, j:j + D] for j in range(K)])
    slab = jnp.concatenate(taps, axis=1)               # (Q, 2*K*D) f32

    # Fuse conv weight into the fc weight (both linear maps):
    #   W[h*K*D + j*D + w, d] = sum_c conv_w[c,0,h,j] * fc_w[d, c*D + w]
    #   bias_d[d]             = sum_c conv_b[c] * sum_w fc_w[d, c*D + w]
    fc_w3 = fc_w.astype(jnp.float32).reshape(D, C, D)  # [d_out, c, w]
    conv_w32 = conv_w.astype(jnp.float32)[:, 0]        # (C, 2, K)
    w_all = jnp.einsum('chj,dcw->hjwd', conv_w32, fc_w3)        # (2, K, D, D)
    w_fused = w_all.reshape(2 * K * D, D)                       # f32
    bias_d = jnp.einsum('dcw,c->d', fc_w3,
                        conv_b.astype(jnp.float32)).reshape(1, D)

    # ---- tile sizes: TE lane-dense (mult of 128), TQ mult of 8 -----------
    TQ = min(tq, _round_up(Q, 8))
    TE = min(te, _round_up(E, 128))
    # v7x has 2 TensorCores: prefer >= 2 tiles on a parallel grid axis.
    if _round_up(E, TE) // TE == 1 and _round_up(Q, TQ) // TQ == 1:
        if _round_up(E, TE) >= 256:
            TE = _round_up(max(TE // 2, 128), 128)
        elif _round_up(Q, TQ) >= 16:
            TQ = _round_up(max(TQ // 2, 8), 8)
    Qp = _round_up(Q, TQ)
    Ep = _round_up(E, TE)

    slab_p = jnp.pad(slab, ((0, Qp - Q), (0, 0)))                       # f32
    ent_score = jnp.pad(entity_f32, ((0, Ep - E), (0, 0))).astype(score_dtype)

    # ---- pallas_call 1: lin (small, Q-tiled) ------------------------------
    est_lin = (2 * TQ * (2 * K * D) * 4        # slab tiles (f32, dbl-buffered)
               + (2 * K * D) * D * 4           # fused weight (constant index)
               + D * 4                         # bias
               + 2 * TQ * D * jnp.dtype(score_dtype).itemsize)
    lin = pl.pallas_call(
        lin_kernel,
        out_shape=jax.ShapeDtypeStruct((Qp, D), score_dtype),
        grid=(Qp // TQ,),
        in_specs=[
            pl.BlockSpec((TQ, 2 * K * D), lambda qi: (qi, 0)),   # slab
            pl.BlockSpec((2 * K * D, D), lambda qi: (0, 0)),     # w_fused
            pl.BlockSpec((1, D), lambda qi: (0, 0)),             # bias
        ],
        out_specs=pl.BlockSpec((TQ, D), lambda qi: (qi, 0)),
        compiler_params=pltpu.CompilerParams(
            dimension_semantics=("parallel",),
            vmem_limit_bytes=_vmem_limit(est_lin)),
    )(slab_p, w_fused, bias_d)

    # ---- pallas_call 2: scores (entity axis OUTER -> single entity pass) --
    out_isz = jnp.dtype(out_dtype).itemsize
    lin_isz = jnp.dtype(score_dtype).itemsize
    est_score = (2 * TQ * D * lin_isz          # lin tiles
                 + 2 * TE * D * lin_isz        # entity tiles
                 + 2 * TQ * TE * out_isz)      # output tiles
    grid = (Ep // TE, Qp // TQ)                # ei outer, qi inner
    out = pl.pallas_call(
        score_kernel,
        out_shape=jax.ShapeDtypeStruct((Qp, Ep), out_dtype),
        grid=grid,
        in_specs=[
            pl.BlockSpec((TQ, D), lambda ei, qi: (qi, 0)),       # lin (re-streamed, tiny)
            pl.BlockSpec((TE, D), lambda ei, qi: (ei, 0)),       # entity (outer only)
        ],
        out_specs=pl.BlockSpec((TQ, TE), lambda ei, qi: (qi, ei)),
        compiler_params=pltpu.CompilerParams(
            dimension_semantics=("parallel", "parallel"),
            vmem_limit_bytes=_vmem_limit(est_score)),
    )(lin, ent_score)

    return out[:Q, :E]


# --------------------------------------------------------------------------
# Pure-JAX reference mirroring the torch forward (correctness check only).
# --------------------------------------------------------------------------
def conv_transe_reference(entity_ebd, relation_ebd, query, conv_w, conv_b, fc_w,
                          *, num_channel, kernel_length):
    E, D = entity_ebd.shape
    C, K = num_channel, kernel_length
    e_rows = entity_ebd[query[:, 0]]
    r_rows = relation_ebd[query[:, 1]]
    if K % 2 != 0:
        pad_l, pad_r = K // 2, K // 2
    else:
        pad_l, pad_r = K // 2 - 1, K // 2
    x = jnp.stack([e_rows, r_rows], axis=1)[:, None]          # (Q,1,2,D) NCHW
    x = jnp.pad(x, ((0, 0), (0, 0), (0, 0), (pad_l, pad_r)))
    y = jax.lax.conv_general_dilated(
        x, conv_w, window_strides=(1, 1), padding='VALID',
        dimension_numbers=('NCHW', 'OIHW', 'NCHW'))           # (Q,C,1,D)
    y = y + conv_b[None, :, None, None]
    flat = y.reshape(y.shape[0], -1)                          # (Q, C*D)
    lin = jnp.maximum(flat @ fc_w.T, 0.0)                     # (Q, D)
    scores = lin @ entity_ebd.T                               # (Q, E)
    return jax.nn.sigmoid(scores)


if __name__ == "__main__":
    root_key = jax.random.PRNGKey(0)

    def run_case(key, *, D, C, K, E, R, Q, tq, te):
        k1, k2, k3, k4, k5, k6 = jax.random.split(key, 6)
        entity_ebd = jax.random.normal(k1, (E, D), jnp.float32)
        relation_ebd = jax.random.normal(k2, (R, D), jnp.float32)
        query = jnp.stack(
            [jax.random.randint(k3, (Q,), 0, E),
             jax.random.randint(k4, (Q,), 0, R)], axis=1)

        # Shapes from the module __init__:
        # conv: Conv2d(1, C, (2, K)) -> weight (C,1,2,K), bias (C,)
        # fc:   Linear(C*D, D, bias=False) -> weight (D, C*D)
        conv_w = 0.1 * jax.random.normal(k5, (C, 1, 2, K), jnp.float32)
        conv_b = 0.01 * jnp.arange(C, dtype=jnp.float32)
        fc_w = 0.1 * jax.random.normal(k6, (D, C * D), jnp.float32)

        out = conv_transe_forward(entity_ebd, relation_ebd, query,
                                  conv_w, conv_b, fc_w,
                                  num_channel=C, kernel_length=K,
                                  tq=tq, te=te)
        out = jax.block_until_ready(out)

        ref = conv_transe_reference(entity_ebd, relation_ebd, query,
                                    conv_w, conv_b, fc_w,
                                    num_channel=C, kernel_length=K)
        # bf16 score matmul + bf16 output -> loosened tolerance vs f32 ref.
        np.testing.assert_allclose(np.asarray(out.astype(jnp.float32)),
                                   np.asarray(ref),
                                   rtol=5e-2, atol=2.5e-2)

    key_a, key_b = jax.random.split(root_key)
    # Odd K; multi-tile grid over both E (3 tiles, outer) and Q (3 tiles) + padding.
    run_case(key_a, D=32, C=4, K=3, E=300, R=7, Q=20, tq=8, te=128)
    # Even K (ZeroPad2d((K//2-1, K//2)) convention); default tiles exercise the
    # >=2-tile (v7x 2-TC) heuristic and E padding.
    run_case(key_b, D=32, C=3, K=4, E=64, R=5, Q=10, tq=512, te=2048)

    print("KERNEL_OK")
</pallas_src>

<mosaic_0001>
module attributes {stable_mosaic.version = 11 : i64} {
  func.func @lin_kernel(%arg0: i32, %arg1: memref<8x192xf32, #tpu.memory_space<vmem>>, %arg2: memref<192x32xf32, #tpu.memory_space<vmem>>, %arg3: memref<1x32xf32, #tpu.memory_space<vmem>>, %arg4: memref<8x32xbf16, #tpu.memory_space<vmem>>) attributes {dimension_semantics = [#tpu.dimension_semantics<parallel>], iteration_bounds = array<i64: 3>, scalar_prefetch = 0 : i64, scratch_operands = 0 : i64, tpu.core_type = #tpu.core_type<tc>, window_params = [{transform_indices = @transform_0, window_bounds = array<i64: 8, 192>}, {pipeline_mode = #tpu.pipeline_mode<synchronous>, transform_indices = @transform_1, window_bounds = array<i64: 192, 32>}, {pipeline_mode = #tpu.pipeline_mode<synchronous>, transform_indices = @transform_2, window_bounds = array<i64: 1, 32>}, {transform_indices = @transform_3, window_bounds = array<i64: 8, 32>}]} {
    %c0 = arith.constant 0 : index
    %c0_0 = arith.constant 0 : index
    %0 = vector.load %arg1[%c0, %c0_0] : memref<8x192xf32, #tpu.memory_space<vmem>>, vector<8x192xf32>
    %c0_1 = arith.constant 0 : index
    %c0_2 = arith.constant 0 : index
    %1 = vector.load %arg2[%c0_1, %c0_2] : memref<192x32xf32, #tpu.memory_space<vmem>>, vector<192x32xf32>
    %cst = arith.constant dense<0.000000e+00> : vector<8x32xf32>
    %2 = tpu.matmul %0, %1, %cst {dimension_numbers = #tpu.dot_dimension_numbers<[1], [0], [0], [1], [0, 0, 1, 1], [], []>} : vector<8x192xf32>, vector<192x32xf32>, vector<8x32xf32> -> vector<8x32xf32>
    %c0_3 = arith.constant 0 : index
    %c0_4 = arith.constant 0 : index
    %3 = vector.load %arg3[%c0_3, %c0_4] : memref<1x32xf32, #tpu.memory_space<vmem>>, vector<1x32xf32>
    %4 = vector.broadcast %3 : vector<1x32xf32> to vector<8x32xf32>
    %5 = arith.addf %2, %4 : vector<8x32xf32>
    %cst_5 = arith.constant 0.000000e+00 : f32
    %6 = vector.broadcast %cst_5 : f32 to vector<8x32xf32>
    %7 = arith.maximumf %5, %6 : vector<8x32xf32>
    %8 = arith.truncf %7 : vector<8x32xf32> to vector<8x32xbf16>
    %c0_6 = arith.constant 0 : index
    %c0_7 = arith.constant 0 : index
    %9 = vector.load %arg4[%c0_6, %c0_7] : memref<8x32xbf16, #tpu.memory_space<vmem>>, vector<8x32xbf16>
    tpu.vector_store %arg4[%c0_6, %c0_7], %8 {strides = array<i32>} : memref<8x32xbf16, #tpu.memory_space<vmem>>, vector<8x32xbf16>,
    return
  }
  func.func @transform_0(%arg0: i32) -> (i32, i32) {
    %c0_i32 = arith.constant 0 : i32
    %c0_i32_0 = arith.constant 0 : i32
    return %arg0, %c0_i32 : i32, i32
  }
  func.func @transform_1(%arg0: i32) -> (i32, i32) {
    %c0_i32 = arith.constant 0 : i32
    %c0_i32_0 = arith.constant 0 : i32
    %c0_i32_1 = arith.constant 0 : i32
    return %c0_i32, %c0_i32_0 : i32, i32
  }
  func.func @transform_2(%arg0: i32) -> (i32, i32) {
    %c0_i32 = arith.constant 0 : i32
    %c0_i32_0 = arith.constant 0 : i32
    %c0_i32_1 = arith.constant 0 : i32
    return %c0_i32, %c0_i32_0 : i32, i32
  }
  func.func @transform_3(%arg0: i32) -> (i32, i32) {
    %c0_i32 = arith.constant 0 : i32
    %c0_i32_0 = arith.constant 0 : i32
    return %arg0, %c0_i32 : i32, i32
  }
}

</mosaic_0001>

<bundles_post_ra>
// kernel: tpu_custom_call.1
= control target key start
LH: loop header
LB: loop body
LE: loop exit
PB: predicated region body
PF: predicated region fallthrough
CT: control target
= control target key end

     0   :  { %8 = vsyncpa [#allocation3], 0  ;;  %s681_s0 = inlined_call_operand.vmem [shape: f32[24,192], index: 0, kind: input, shape index: {}]   ;;  %s682_s1 = inlined_call_operand.vmem [shape: f32[192,32], index: 1, kind: input, shape index: {}]   ;;  %s683_s2 = inlined_call_operand.vmem [shape: f32[1,32], index: 2, kind: input, shape index: {}]   ;;  %s684_s3 = inlined_call_operand.hbm [shape: bf16[24,32], index: 3, kind: output, shape index: {}]  }
   0x1   :  { %10 = vsyncpa [#allocation3 + $0x1], 0  ;;  %s491_s12 = smov 0   ;;  %s493_s13 = smov 0  }
   0x2   :  { %s495_s14 = smov 0   ;;  %s497_s15 = smov 0  }
   0x3 LB: > { %s512_s16 = sadd.s32 4294967295, %s467_s15   ;;  %s353_s17 = sadd.s32 4294967294, %s467_s15   ;;  %s467_s15 = sphi %s497_s15, %s690_s15   ;;  %s463_s14 = sphi %s495_s14, %s689_s14   ;;  %s459_s13 = sphi %s493_s13, %s688_s13   ;;  %s455_s12 = sphi %s491_s12, %s687_s12  }
   0x4   : > { %s516_s18 = sadd.s32 1, %s467_s15   ;;  %s91_s19 = sadd.s32 1, %s463_s14 }
   0x5   : > { %s88_s20 = ssub.s32 %s467_s15, %s516_s18  ;;  %p101_p0 = scmp.ne.s32.totalorder %s463_s14, %s459_s13 }
   0x6   : > { %p89_p1 = scmp.eq.s32.totalorder %s88_s20, 0  ;;  %p102_p2 = scmp.eq.s32.totalorder %s512_s16, 2 }
   0x7   : > { %p107_p3 = scmp.ne.s32.totalorder %s459_s13, %s455_s12  ;;  %p108_p4 = scmp.eq.s32.totalorder %s353_s17, 2 }
   0x8   : > { %s527_s21 = scalar_select %p89_p1, %s463_s14, %s91_s19  }
   0x9   : > { %p529_p5 = por %p102_p2, %p101_p0  ;;  %p533_p6 = por %p108_p4, %p107_p3 }
   0xa   : > { %p356_p7 = scmp.ge.s32.totalorder %s467_s15, 1  ;;  %p140_p8 = scmp.lt.s32.totalorder %s467_s15, 4 }
   0xc   : > { %p141_p9 = pnand %p356_p7, %p140_p8 }
   0xd   : > { %p164_p10 = scmp.lt.s32.totalorder (!%p141_p9), %s512_s16, 2  ;;  %s161_s25 = sand.u32 (!%p141_p9), 1, %s459_s13  }
   0xe   : > { %144 = sbr.rel (%p141_p9) target bundleno = 280 (0x118), region = 32  ;;  %s357_s26 = sshll.u32 (!%p141_p9), %s161_s25, 2 }
   0xf   : > { %s363_s29 = sshll.u32 (!%p141_p9), %s512_s16, 6  ;;  %s163_s30 = scalar_lea.vmem (!%p141_p9), [#allocation2], %s357_s26 }
  0x10   : > { %s292_s6 = scalar_lea.hbm (!%p141_p9), %s684_s3, %s363_s29  ;;  %s281_s7 = scalar_lea.sflag (!%p141_p9), [#allocation3], %s161_s25 }
  0x11   : > { %s470_s10 = smov (!%p141_p9), [#allocation2]  }
  0x12   : > { %s411_s11 = sshll.u32 (!%p141_p9), %s470_s10, 4  ;;  %s412_s11 = int_to_ptr.vmem [resolvable:$false] %s411_s11 }
  0x13   : > { %v186_v0 = vld [vmem:[%s682_s1 + $0x78] sm:$0xff]  ;;  %v469_v1 = vmov 0.0   ;;  %v185_v2 = vld [vmem:[%s682_s1 + $0x70] sm:$0xff]  ;;  %s165_s28 = scalar_select %p164_p10, %s512_s16, 2  ;;  %v184_v3 = vld [vmem:[%s682_s1 + $0x68] sm:$0xff]  ;;  %vm202_vm0 = vcmask 523264  }
  0x14   : > { %206 = vmatprep.subr.mxu0 %v469_v1  ;;  %v183_v4 = vld [vmem:[%s682_s1 + $0x60] sm:$0xff]  ;;  %v182_v5 = vld [vmem:[%s682_s1 + $0x58] sm:$0xff]  ;;  %v181_v7 = vld [vmem:[%s682_s1 + $0x50] sm:$0xff]  ;;  %vm278_vm1 = vcmask 257024   ;;  %s413_s16 = scalar_lea.vmem %s412_s11, 128 }
  0x15   : > { %207 = vmatpush1.msra.mxu0 %v186_v0  ;;  %s366_s4 = sshll.u32 %s165_s28, 4  ;;  %v180_v8 = vld [vmem:[%s682_s1 + $0x48] sm:$0xff]  ;;  %v179_v9 = vld [vmem:[%s682_s1 + $0x40] sm:$0xff]  ;;  %v178_v10 = vld [vmem:[%s682_s1 + $0x38] sm:$0xff] }
  0x16   : > { %208 = vmatprep.subr.mxu0 %v469_v1  ;;  %s559_s9 = scalar_lea.vmem %s681_s0, %s366_s4  ;;  %v177_v11 = vld [vmem:[%s682_s1 + $0x30] sm:$0xff]  ;;  %v176_v12 = vld [vmem:[%s682_s1 + $0x28] sm:$0xff]  ;;  %v175_v13 = vld [vmem:[%s682_s1 + $0x20] sm:$0xff]  ;;  %s294_s4 = sshll.u32 %s163_s30, 4  ;;  %s295_s4 = int_to_ptr.vmem [resolvable:$true] %s294_s4 }
  0x17   : > { %209 = vmatpush1.msra.mxu0 %v185_v2  ;;  %v170_v6 = vld [vmem:[%s559_s9 + $0x8] sm:$0xff]  ;;  %v174_v14 = vld [vmem:[%s682_s1 + $0x18] sm:$0xff]  ;;  %v173_v15 = vld [vmem:[%s682_s1 + $0x10] sm:$0xff]  ;;  %s407_s8 = scalar_lea.vmem %s295_s4, 64  ;;  %p414_p0 = scmp.lt.s32.totalorder %s295_s4, %s412_s11 }
  0x18   : > { %210 = vmatprep.subr.mxu0 %v469_v1  ;;  %361 = vmatprep.mubr.msk.f32.mxu0 %vm202_vm0, %v170_v6  ;;  %v172_v16 = vld [vmem:[%s682_s1 + $0x8] sm:$0xff]  ;;  %v171_v17 = vld [vmem:[%s682_s1] sm:$0xff]  ;;  %v194_v18 = vld [vmem:[%s682_s1 + $0xb8] sm:$0xff]  ;;  %p408_p11 = scmp.ne.s32.totalorder %s295_s4, %s407_s8  ;;  %p415_p1 = scmp.lt.s32.totalorder %s413_s16, %s407_s8 }
  0x19   : > { %211 = vmatpush1.msra.mxu0 %v184_v3  ;;  %v193_v19 = vld [vmem:[%s682_s1 + $0xb0] sm:$0xff]  ;;  %v192_v20 = vld [vmem:[%s682_s1 + $0xa8] sm:$0xff]  ;;  %v191_v21 = vld [vmem:[%s682_s1 + $0xa0] sm:$0xff] }
  0x1a   : > { %212 = vmatprep.subr.mxu0 %v469_v1  ;;  %v190_v22 = vld [vmem:[%s682_s1 + $0x98] sm:$0xff]  ;;  %v189_v23 = vld [vmem:[%s682_s1 + $0x90] sm:$0xff]  ;;  %v188_v24 = vld [vmem:[%s682_s1 + $0x88] sm:$0xff]  ;;  %p409_p12 = pnand %p408_p11, %p529_p5  ;;  %p416_p2 = por %p415_p1, %p414_p0 }
  0x1b   : > { %213 = vmatpush1.msra.mxu0 %v183_v4  ;;  %v187_v25 = vld [vmem:[%s682_s1 + $0x80] sm:$0xff] }
  0x1c   : > { %214 = vmatprep.subr.mxu0 %v469_v1  ;;  %v169_v26 = vld [vmem:[%s559_s9] sm:$0xff]  ;;  %p410_p13 = pneg %p409_p12 }
  0x1d   : > { %215 = vmatpush1.msra.mxu0 %v182_v5  ;;  %v360_v27 = vld [vmem:[%s683_s2] ss:$0 sm:$0xff] }
  0x1e   : > { %216 = vmatprep.subr.mxu0 %v469_v1  ;;  %p417_p3 = pnand %p416_p2, %p410_p13 }
  0x1f   : > { %217 = vmatpush1.msra.mxu0 %v181_v7 }
  0x20   : > { %218 = vmatprep.subr.mxu0 %v469_v1 }
  0x21   : > { %219 = vmatpush1.msra.mxu0 %v180_v8 }
  0x22   : > { %220 = vmatprep.subr.mxu0 %v469_v1 }
  0x23   : > { %221 = vmatpush1.msra.mxu0 %v179_v9 }
  0x24   : > { %222 = vmatprep.subr.mxu0 %v469_v1 }
  0x25   : > { %223 = vmatpush1.msra.mxu0 %v178_v10 }
  0x26   : > { %224 = vmatprep.subr.mxu0 %v469_v1 }
  0x27   : > { %225 = vmatpush1.msra.mxu0 %v177_v11 }
  0x28   : > { %226 = vmatprep.subr.mxu0 %v469_v1 }
  0x29   : > { %227 = vmatpush1.msra.mxu0 %v176_v12 }
  0x2a   : > { %228 = vmatprep.subr.mxu0 %v469_v1 }
  0x2b   : > { %229 = vmatpush1.msra.mxu0 %v175_v13 }
  0x2c   : > { %230 = vmatprep.subr.mxu0 %v469_v1 }
  0x2d   : > { %231 = vmatpush1.msra.mxu0 %v174_v14 }
  0x2e   : > { %232 = vmatprep.subr.mxu0 %v469_v1 }
  0x2f   : > { %233 = vmatpush1.msra.mxu0 %v173_v15 }
  0x30   : > { %234 = vmatprep.subr.mxu0 %v469_v1 }
  0x31   : > { %235 = vmatpush1.msra.mxu0 %v172_v16 }
  0x32   : > { %236 = vmatprep.subr.mxu0 %v469_v1 }
  0x33   : > { %237 = vmatpush1.msra.mxu0 %v171_v17 }
  0x34   : > { %254 = vmatprep.subr.mxu0 %v469_v1 }
  0x35   : > { %255 = vmatpush2.msra.mxu0 %v194_v18 }
  0x36   : > { %256 = vmatprep.subr.mxu0 %v469_v1 }
  0x37   : > { %257 = vmatpush2.msra.mxu0 %v193_v19 }
  0x38   : > { %258 = vmatprep.subr.mxu0 %v469_v1 }
  0x39   : > { %259 = vmatpush2.msra.mxu0 %v192_v20 }
  0x3a   : > { %260 = vmatprep.subr.mxu0 %v469_v1 }
  0x3b   : > { %261 = vmatpush2.msra.mxu0 %v191_v21 }
  0x3c   : > { %262 = vmatprep.subr.mxu0 %v469_v1 }
  0x3d   : > { %263 = vmatpush2.msra.mxu0 %v190_v22 }
  0x3e   : > { %264 = vmatprep.subr.mxu0 %v469_v1 }
  0x3f   : > { %265 = vmatpush2.msra.mxu0 %v189_v23 }
  0x40   : > { %266 = vmatprep.subr.mxu0 %v469_v1 }
  0x41   : > { %267 = vmatpush2.msra.mxu0 %v188_v24 }
  0x42   : > { %268 = vmatprep.subr.mxu0 %v469_v1 }
  0x43   : > { %269 = vmatpush2.msra.mxu0 %v187_v25 }
  0x44   : > { %271 = vmatmul.mubr.f32.vlgmr.msra.gmra.mxu0 %v169_v26 }
 0x104   : > { %v272_v28 = vpop.f32.mrf.mxu0 }
 0x105   : > { %v273_v29 = vadd.f32 %v360_v27, %v272_v28 }
 0x106   : > { %v274_v30 = vpop.f32.mrf.mxu0 }
 0x107   : > { %v276_v31 = vmax.f32 %v273_v29, 0.0 }
 0x109   : > { %v277_v32 = vpack.c.bf16 %v276_v31, %v276_v31 }
 0x10b   : > { %279 = vst.msk [vmem:[%s163_s30] sm:$0xf] %vm278_vm1, %v277_v32 }
 0x10c   : > { %420 = shalt.err (!%p417_p3)
}
 0x10d   : > { %s421_s17 = scalar_lea.hbm %s292_s6, 64  ;;  %s425_s24 = scalar_lea.hbm %s684_s3, 192 }
 0x10e   : > { %p422_p4 = scmp.ne.s32.totalorder %s292_s6, %s421_s17  ;;  %p426_p9 = scmp.lt.s32.totalorder %s292_s6, %s684_s3 }
 0x10f   : > { %p427_p10 = scmp.lt.s32.totalorder %s425_s24, %s421_s17 }
 0x110   : > { %p423_p7 = pnand %p422_p4, %p529_p5 }
 0x111   : > { %p428_p11 = por %p427_p10, %p426_p9 }
 0x112   : > { %p424_p8 = pneg %p423_p7 }
 0x114   : > { %p429_p12 = pnand %p428_p11, %p424_p8 }
 0x116   : > { %432 = shalt.err (!%p429_p12)
}
 0x117   : > { %367 = dma.vmem_to_hbm [thread:$0]  (%p529_p5), %s295_s4, 64, %s292_s6, %s281_s7  }
 0x118 PF: > { %p373_p13 = scmp.ge.s32.totalorder %s467_s15, 2  ;;  %s306_s27 = sand.u32 1, %s455_s12  }
 0x119   : > { %s307_s28 = scalar_lea.sflag [#allocation3], %s306_s27 }
 0x11a   : > { %p370_p0 = pnand %p373_p13, %p533_p6 }
 0x11c   : > { %p371_p1 = pneg %p370_p0 }
 0x11e   : > { %450 = dma.done.wait (%p371_p1), %s307_s28, 64  }
 0x11f   : > { %452 = vsyncadd (%p371_p1), %s307_s28, 4294967232  ;;  %p13_p2 = scmp.ge.s32.totalorder %s516_s18, 5   ;;  %s687_s12 = smov %s459_s13 }
 0x120   : > { %s688_s13 = smov %s463_s14  ;;  %s689_s14 = smov %s527_s21 }
 0x121   : > { %s690_s15 = smov %s516_s18  ;;  %15 = sbr.rel (!%p13_p2) target bundleno = 3 (0x3), region = 67 }
 0x126   :  { %312 = vsyncpa [#allocation3], 1 }
 0x127   :  { %314 = vsyncpa [#allocation3 + $0x1], 1 }

</bundles_post_ra>
